<compile_context>
chip_gen: v7x
topology: tpu7x:2x2x1
jax: 0.10.0
libtpu: 0.0.40
codegen_flags: <defaults>
</compile_context>

<pallas_src>
from functools import partial

import jax
import jax.numpy as jnp
from jax.experimental import pallas as pl
from jax.experimental.pallas import tpu as pltpu


# ---------------------------------------------------------------------------
# Tiling / VMEM helpers
# ---------------------------------------------------------------------------
_LANE = 128
_SUBLANE = 8


def _round_up(x, m):
    return ((x + m - 1) // m) * m


def _vmem_limit_bytes():
    """Scoped-VMEM limit: ~85% of the chip's VMEM (v5e/v6e 128 MiB, v7x
    64 MiB/TC).  Fall back to 64 MiB only if the hardware query fails."""
    try:
        info = pltpu.get_tpu_info()
        cap = int(getattr(info, "vmem_capacity_bytes", 64 * 1024 * 1024))
    except Exception:
        cap = 64 * 1024 * 1024
    return max(32 * 1024 * 1024, int(cap * 0.85))


def _batch_tile(B):
    """Batch tile: full B when tiny, otherwise a multiple of 8 capped at 256
    (fills the 256-wide MXU M-dim on v6e/v7x; neutral on v5e)."""
    if B <= _SUBLANE:
        return B
    return min(256, (B // _SUBLANE) * _SUBLANE)


def _seq_tile(N, D, TB, itemsize, avail_bytes):
    """Largest patch-token tile (multiple of 8, or full N) whose *double
    buffered* (TB, TN, D) block fits in `avail_bytes`."""
    per_row = 2 * TB * D * itemsize            # 2 pipeline buffers per row
    if per_row * N <= avail_bytes:
        return N
    tn = avail_bytes // max(1, per_row)
    tn = max(_SUBLANE, (tn // _SUBLANE) * _SUBLANE)
    return min(tn, N)


# ---------------------------------------------------------------------------
# Kernels
# ---------------------------------------------------------------------------
def _fused_avgpool_linear_kernel(*refs, n_blocks, inv_n, n_valid, tn,
                                 needs_mask):
    # refs = [patch, cls_0..cls_{n-1}, w_cls_0..w_cls_{n-1}, w_pool, bias,
    #         out, acc_scratch]
    patch_ref = refs[0]
    cls_refs = refs[1:1 + n_blocks]
    w_cls_refs = refs[1 + n_blocks:1 + 2 * n_blocks]
    w_pool_ref = refs[1 + 2 * n_blocks]
    b_ref = refs[2 + 2 * n_blocks]
    out_ref = refs[3 + 2 * n_blocks]
    acc_ref = refs[4 + 2 * n_blocks]

    k = pl.program_id(1)
    nk = pl.num_programs(1)

    @pl.when(k == 0)
    def _():
        acc_ref[...] = jnp.zeros_like(acc_ref)

    if needs_mask:
        # Interior tiles: unmasked, convert fused into the reduction.
        @pl.when(k < nk - 1)
        def _():
            acc_ref[...] += jnp.sum(patch_ref[...], axis=1, dtype=jnp.float32)

        # Only the ragged last tile pays for iota/compare/select.
        @pl.when(k == nk - 1)
        def _():
            rows = k * tn + jax.lax.broadcasted_iota(
                jnp.int32, patch_ref.shape, 1)
            patch = jnp.where(rows < n_valid, patch_ref[...],
                              jnp.zeros((), patch_ref.dtype))
            acc_ref[...] += jnp.sum(patch, axis=1, dtype=jnp.float32)
    else:
        acc_ref[...] += jnp.sum(patch_ref[...], axis=1, dtype=jnp.float32)

    @pl.when(k == nk - 1)
    def _():
        mean_patch = acc_ref[...] * inv_n                 # avgpool over N
        # Module semantics: matmul in f32 (`.float()`), so cast up if needed.
        logits = jnp.dot(mean_patch, w_pool_ref[...].astype(jnp.float32),
                         preferred_element_type=jnp.float32)
        for c_ref, w_ref in zip(cls_refs, w_cls_refs):
            logits += jnp.dot(c_ref[...].astype(jnp.float32),
                              w_ref[...].astype(jnp.float32),
                              preferred_element_type=jnp.float32)
        out_ref[...] = (logits + b_ref[...].astype(jnp.float32)
                        ).astype(out_ref.dtype)


def _cls_linear_kernel(*refs, n_blocks):
    # refs = [cls_0..cls_{n-1}, w_0..w_{n-1}, bias, out]
    cls_refs = refs[:n_blocks]
    w_refs = refs[n_blocks:2 * n_blocks]
    b_ref = refs[2 * n_blocks]
    out_ref = refs[2 * n_blocks + 1]

    acc = None
    for c_ref, w_ref in zip(cls_refs, w_refs):
        d = jnp.dot(c_ref[...].astype(jnp.float32),
                    w_ref[...].astype(jnp.float32),
                    preferred_element_type=jnp.float32)
        acc = d if acc is None else acc + d
    out_ref[...] = (acc + b_ref[...].astype(jnp.float32)).astype(out_ref.dtype)


# ---------------------------------------------------------------------------
# Weight preparation (one-time per weight; hoist/cache in real use)
# ---------------------------------------------------------------------------
def _prepare_weights(weight, bias, num_classes):
    """W -> W^T, zero-padded to a lane-dense class dim (skipped if aligned)."""
    Cp = _round_up(max(num_classes, _LANE), _LANE)
    wt = jnp.transpose(weight)
    b = bias.astype(jnp.float32)
    if Cp != num_classes:
        wt = jnp.pad(wt, ((0, 0), (0, Cp - num_classes)))
        b = jnp.pad(b, (0, Cp - num_classes))
    return wt, b.reshape(1, Cp), Cp


# ---------------------------------------------------------------------------
# Wrapper (LinearClassifier.forward equivalent)
# ---------------------------------------------------------------------------
def linear_classifier_forward(x_tokens_list, weight, bias,
                              use_n_blocks, use_avgpool):
    """
    x_tokens_list: list of (patch_tokens (B,N,D), class_token (B,Dc_i)) pairs.
    weight: (num_classes, out_dim)   bias: (num_classes,)
    """
    num_classes, out_dim = weight.shape
    intermediate = x_tokens_list[-use_n_blocks:]
    cls_list = [ct for _, ct in intermediate]
    n_blocks = len(cls_list)
    cls_dims = [int(ct.shape[-1]) for ct in cls_list]
    Dc = sum(cls_dims)
    B = cls_list[0].shape[0]

    # TODO(synk): _prepare_weights is a tiny one-time-per-weight transform;
    # cache it outside the evaluation loop when calling this repeatedly.
    wt, b2, Cp = _prepare_weights(weight, bias, num_classes)

    # Per-class-token slices of W^T (and the avgpool slice, if used).
    offs, off = [], 0
    for d in cls_dims:
        offs.append(off)
        off += d
    w_cls_list = [wt[o:o + d] for o, d in zip(offs, cls_dims)]

    vmem_limit = _vmem_limit_bytes()
    TB = _batch_tile(B)
    nb = pl.cdiv(B, TB)

    def resident_spec(shape, imap, n_buf):
        # Grid-invariant operand: a single VMEM buffer (no double buffering).
        if n_buf == 1:
            return pl.BlockSpec(shape, imap, pipeline_mode=pl.Buffered(1))
        return pl.BlockSpec(shape, imap)

    if use_avgpool:
        patch = intermediate[-1][0]                       # (B, N, D)
        _, N, D = patch.shape
        assert out_dim == Dc + D, (out_dim, Dc, D)
        w_pool = wt[Dc:Dc + D]

        def run(n_w_buf):
            w_item = wt.dtype.itemsize
            cls_item = cls_list[0].dtype.itemsize
            # Statically-resident VMEM footprint (subtracted before sizing TN).
            fixed = ((Dc + D) * Cp * w_item * n_w_buf      # W^T slices
                     + _SUBLANE * Cp * 4 * n_w_buf         # bias (sublane-pad)
                     + 2 * TB * Dc * cls_item              # class tokens (x2)
                     + 2 * TB * Cp * 4                     # output (x2)
                     + TB * D * 4)                         # f32 accumulator
            avail = int((vmem_limit - fixed) * 0.9)        # compiler headroom
            # TODO(synk): if `fixed` alone exceeds VMEM (enormous out_dim*Cp),
            # the weight K-dim would need its own grid axis; not required for
            # DINOv2 linear-probe shapes once the weights are single-buffered.
            avail = max(avail, 2 * TB * _SUBLANE * D * patch.dtype.itemsize)
            TN = _seq_tile(N, D, TB, patch.dtype.itemsize, avail)
            nk = pl.cdiv(N, TN)

            kernel = partial(_fused_avgpool_linear_kernel,
                             n_blocks=n_blocks, inv_n=1.0 / float(N),
                             n_valid=N, tn=TN, needs_mask=(N % TN != 0))

            # TODO(synk): if xprof shows DMA issue gaps between k steps, bump
            # the patch spec to pipeline_mode=pl.Buffered(3).
            in_specs = (
                [pl.BlockSpec((TB, TN, D), lambda i, k: (i, k, 0))]
                + [pl.BlockSpec((TB, d), lambda i, k: (i, 0))
                   for d in cls_dims]
                + [resident_spec((d, Cp), lambda i, k: (0, 0), n_w_buf)
                   for d in cls_dims]
                + [resident_spec((D, Cp), lambda i, k: (0, 0), n_w_buf),
                   resident_spec((1, Cp), lambda i, k: (0, 0), n_w_buf)])

            cost = pl.CostEstimate(
                flops=int(2 * B * (Dc + D) * Cp + B * N * D),
                transcendentals=0,
                bytes_accessed=int(B * N * D * patch.dtype.itemsize
                                   + B * Dc * cls_item
                                   + (Dc + D) * Cp * w_item
                                   + Cp * 4 + B * Cp * 4))

            return pl.pallas_call(
                kernel,
                out_shape=jax.ShapeDtypeStruct((B, Cp), jnp.float32),
                grid_spec=pltpu.PrefetchScalarGridSpec(
                    num_scalar_prefetch=0,
                    grid=(nb, nk),
                    in_specs=in_specs,
                    out_specs=pl.BlockSpec((TB, Cp), lambda i, k: (i, 0)),
                    scratch_shapes=[pltpu.VMEM((TB, D), jnp.float32)]),
                compiler_params=pltpu.CompilerParams(
                    dimension_semantics=("parallel", "arbitrary"),
                    vmem_limit_bytes=vmem_limit),
                cost_estimate=cost,
            )(patch, *cls_list, *w_cls_list, w_pool, b2)

        try:
            out_padded = run(1)       # single-buffered resident weights
        except Exception:             # jax without Buffered(1): double-buffer
            out_padded = run(2)

    else:
        assert out_dim == Dc, (out_dim, Dc)

        def run(n_w_buf):
            in_specs = (
                [pl.BlockSpec((TB, d), lambda i: (i, 0)) for d in cls_dims]
                + [resident_spec((d, Cp), lambda i: (0, 0), n_w_buf)
                   for d in cls_dims]
                + [resident_spec((1, Cp), lambda i: (0, 0), n_w_buf)])

            cost = pl.CostEstimate(
                flops=int(2 * B * Dc * Cp),
                transcendentals=0,
                bytes_accessed=int(B * Dc * cls_list[0].dtype.itemsize
                                   + Dc * Cp * wt.dtype.itemsize
                                   + Cp * 4 + B * Cp * 4))

            return pl.pallas_call(
                partial(_cls_linear_kernel, n_blocks=n_blocks),
                out_shape=jax.ShapeDtypeStruct((B, Cp), jnp.float32),
                grid_spec=pltpu.PrefetchScalarGridSpec(
                    num_scalar_prefetch=0,
                    grid=(nb,),
                    in_specs=in_specs,
                    out_specs=pl.BlockSpec((TB, Cp), lambda i: (i, 0))),
                compiler_params=pltpu.CompilerParams(
                    dimension_semantics=("parallel",),
                    vmem_limit_bytes=vmem_limit),
                cost_estimate=cost,
            )(*cls_list, *w_cls_list, b2)

        try:
            out_padded = run(1)
        except Exception:
            out_padded = run(2)

    if Cp != num_classes:
        return out_padded[:, :num_classes]
    return out_padded


# ---------------------------------------------------------------------------
# Pure-JAX reference (mirrors the PyTorch code) for verification
# ---------------------------------------------------------------------------
def _reference(x_tokens_list, weight, bias, use_n_blocks, use_avgpool):
    intermediate = x_tokens_list[-use_n_blocks:]
    output = jnp.concatenate([ct for _, ct in intermediate], axis=-1)
    if use_avgpool:
        output = jnp.concatenate(
            (output, jnp.mean(intermediate[-1][0], axis=1)), axis=-1)
        output = output.reshape(output.shape[0], -1)
    output = output.astype(jnp.float32)
    return output @ weight.T.astype(jnp.float32) + bias.astype(jnp.float32)


# ---------------------------------------------------------------------------
if __name__ == "__main__":
    key = jax.random.PRNGKey(0)

    # Small shapes consistent with the module's forward.
    B, N, D = 2, 8, 32                 # batch, patch tokens, embed dim
    n_blocks_total = 3
    use_n_blocks = 2
    num_classes = 10

    # Synthetic frozen-backbone features: list of (patch_tokens, class_token).
    x_tokens_list = []
    for _ in range(n_blocks_total):
        key, k1, k2 = jax.random.split(key, 3)
        patch = jax.random.normal(k1, (B, N, D), dtype=jnp.float32)
        cls = jax.random.normal(k2, (B, D), dtype=jnp.float32)
        x_tokens_list.append((patch, cls))

    for use_avgpool in (True, False):
        out_dim = use_n_blocks * D + (D if use_avgpool else 0)
        key, kw = jax.random.split(key)
        # nn.Linear init: weight ~ N(0, 0.01), zero bias.
        weight = 0.01 * jax.random.normal(kw, (num_classes, out_dim),
                                          dtype=jnp.float32)
        bias = jnp.zeros((num_classes,), dtype=jnp.float32)

        out = linear_classifier_forward(x_tokens_list, weight, bias,
                                        use_n_blocks, use_avgpool)
        out = jax.block_until_ready(out)

        ref = _reference(x_tokens_list, weight, bias, use_n_blocks,
                         use_avgpool)
        assert out.shape == (B, num_classes), out.shape
        assert jnp.allclose(out, ref, atol=1e-5, rtol=1e-5), (
            f"use_avgpool={use_avgpool} "
            f"max abs err {float(jnp.max(jnp.abs(out - ref)))}")

    print("KERNEL_OK")
</pallas_src>

<mosaic_0001>
module attributes {stable_mosaic.version = 11 : i64} {
  func.func @_fused_avgpool_linear_kernel(%arg0: i32, %arg1: i32, %arg2: memref<2x8x32xf32, #tpu.memory_space<vmem>>, %arg3: memref<2x32xf32, #tpu.memory_space<vmem>>, %arg4: memref<2x32xf32, #tpu.memory_space<vmem>>, %arg5: memref<32x128xf32, #tpu.memory_space<vmem>>, %arg6: memref<32x128xf32, #tpu.memory_space<vmem>>, %arg7: memref<32x128xf32, #tpu.memory_space<vmem>>, %arg8: memref<1x128xf32, #tpu.memory_space<vmem>>, %arg9: memref<2x128xf32, #tpu.memory_space<vmem>>, %arg10: memref<2x32xf32, #tpu.memory_space<vmem>>) attributes {dimension_semantics = [#tpu.dimension_semantics<parallel>, #tpu.dimension_semantics<arbitrary>], iteration_bounds = array<i64: 1, 1>, scalar_prefetch = 0 : i64, scratch_operands = 1 : i64, tpu.core_type = #tpu.core_type<tc>, window_params = [{transform_indices = @transform_0, window_bounds = array<i64: 2, 8, 32>}, {transform_indices = @transform_1, window_bounds = array<i64: 2, 32>}, {transform_indices = @transform_2, window_bounds = array<i64: 2, 32>}, {pipeline_mode = #tpu.pipeline_mode<synchronous>, transform_indices = @transform_3, window_bounds = array<i64: 32, 128>}, {pipeline_mode = #tpu.pipeline_mode<synchronous>, transform_indices = @transform_4, window_bounds = array<i64: 32, 128>}, {pipeline_mode = #tpu.pipeline_mode<synchronous>, transform_indices = @transform_5, window_bounds = array<i64: 32, 128>}, {pipeline_mode = #tpu.pipeline_mode<synchronous>, transform_indices = @transform_6, window_bounds = array<i64: 1, 128>}, {transform_indices = @transform_7, window_bounds = array<i64: 2, 128>}]} {
    %c0_i32 = arith.constant 0 : i32
    %0 = arith.cmpi eq, %arg1, %c0_i32 : i32
    %1 = arith.extui %0 : i1 to i32
    %c0_i32_0 = arith.constant 0 : i32
    %2 = arith.cmpi ne, %1, %c0_i32_0 : i32
    scf.if %2 {
      %cst_9 = arith.constant 0.000000e+00 : f32
      %11 = vector.broadcast %cst_9 : f32 to vector<2x32xf32>
      %c0_10 = arith.constant 0 : index
      %c0_11 = arith.constant 0 : index
      %12 = vector.load %arg10[%c0_10, %c0_11] : memref<2x32xf32, #tpu.memory_space<vmem>>, vector<2x32xf32>
      tpu.vector_store %arg10[%c0_10, %c0_11], %11 {strides = array<i32>} : memref<2x32xf32, #tpu.memory_space<vmem>>, vector<2x32xf32>,
    } else {
    }
    %c0 = arith.constant 0 : index
    %c0_1 = arith.constant 0 : index
    %3 = vector.load %arg10[%c0, %c0_1] : memref<2x32xf32, #tpu.memory_space<vmem>>, vector<2x32xf32>
    %c0_2 = arith.constant 0 : index
    %c0_3 = arith.constant 0 : index
    %c0_4 = arith.constant 0 : index
    %4 = vector.load %arg2[%c0_2, %c0_3, %c0_4] : memref<2x8x32xf32, #tpu.memory_space<vmem>>, vector<2x8x32xf32>
    %cst = arith.constant dense<0.000000e+00> : vector<2x32xf32>
    %5 = vector.multi_reduction <add>, %4, %cst [1] : vector<2x8x32xf32> to vector<2x32xf32>
    %6 = arith.addf %3, %5 : vector<2x32xf32>
    %c0_5 = arith.constant 0 : index
    %c0_6 = arith.constant 0 : index
    %7 = vector.load %arg10[%c0_5, %c0_6] : memref<2x32xf32, #tpu.memory_space<vmem>>, vector<2x32xf32>
    tpu.vector_store %arg10[%c0_5, %c0_6], %6 {strides = array<i32>} : memref<2x32xf32, #tpu.memory_space<vmem>>, vector<2x32xf32>,
    %c0_i32_7 = arith.constant 0 : i32
    %8 = arith.cmpi eq, %arg1, %c0_i32_7 : i32
    %9 = arith.extui %8 : i1 to i32
    %c0_i32_8 = arith.constant 0 : i32
    %10 = arith.cmpi ne, %9, %c0_i32_8 : i32
    scf.if %10 {
      %c0_9 = arith.constant 0 : index
      %c0_10 = arith.constant 0 : index
      %11 = vector.load %arg10[%c0_9, %c0_10] : memref<2x32xf32, #tpu.memory_space<vmem>>, vector<2x32xf32>
      %cst_11 = arith.constant 1.250000e-01 : f32
      %12 = vector.broadcast %cst_11 : f32 to vector<2x32xf32>
      %13 = arith.mulf %11, %12 : vector<2x32xf32>
      %c0_12 = arith.constant 0 : index
      %c0_13 = arith.constant 0 : index
      %14 = vector.load %arg7[%c0_12, %c0_13] : memref<32x128xf32, #tpu.memory_space<vmem>>, vector<32x128xf32>
      %cst_14 = arith.constant dense<0.000000e+00> : vector<2x128xf32>
      %15 = tpu.matmul %13, %14, %cst_14 {dimension_numbers = #tpu.dot_dimension_numbers<[1], [0], [0], [1], [0, 0, 1, 1], [], []>} : vector<2x32xf32>, vector<32x128xf32>, vector<2x128xf32> -> vector<2x128xf32>
      %c0_15 = arith.constant 0 : index
      %c0_16 = arith.constant 0 : index
      %16 = vector.load %arg3[%c0_15, %c0_16] : memref<2x32xf32, #tpu.memory_space<vmem>>, vector<2x32xf32>
      %c0_17 = arith.constant 0 : index
      %c0_18 = arith.constant 0 : index
      %17 = vector.load %arg5[%c0_17, %c0_18] : memref<32x128xf32, #tpu.memory_space<vmem>>, vector<32x128xf32>
      %cst_19 = arith.constant dense<0.000000e+00> : vector<2x128xf32>
      %18 = tpu.matmul %16, %17, %cst_19 {dimension_numbers = #tpu.dot_dimension_numbers<[1], [0], [0], [1], [0, 0, 1, 1], [], []>} : vector<2x32xf32>, vector<32x128xf32>, vector<2x128xf32> -> vector<2x128xf32>
      %19 = arith.addf %15, %18 : vector<2x128xf32>
      %c0_20 = arith.constant 0 : index
      %c0_21 = arith.constant 0 : index
      %20 = vector.load %arg4[%c0_20, %c0_21] : memref<2x32xf32, #tpu.memory_space<vmem>>, vector<2x32xf32>
      %c0_22 = arith.constant 0 : index
      %c0_23 = arith.constant 0 : index
      %21 = vector.load %arg6[%c0_22, %c0_23] : memref<32x128xf32, #tpu.memory_space<vmem>>, vector<32x128xf32>
      %cst_24 = arith.constant dense<0.000000e+00> : vector<2x128xf32>
      %22 = tpu.matmul %20, %21, %cst_24 {dimension_numbers = #tpu.dot_dimension_numbers<[1], [0], [0], [1], [0, 0, 1, 1], [], []>} : vector<2x32xf32>, vector<32x128xf32>, vector<2x128xf32> -> vector<2x128xf32>
      %23 = arith.addf %19, %22 : vector<2x128xf32>
      %c0_25 = arith.constant 0 : index
      %c0_26 = arith.constant 0 : index
      %24 = vector.load %arg8[%c0_25, %c0_26] : memref<1x128xf32, #tpu.memory_space<vmem>>, vector<1x128xf32>
      %25 = vector.broadcast %24 : vector<1x128xf32> to vector<2x128xf32>
      %26 = arith.addf %23, %25 : vector<2x128xf32>
      %c0_27 = arith.constant 0 : index
      %c0_28 = arith.constant 0 : index
      %27 = vector.load %arg9[%c0_27, %c0_28] : memref<2x128xf32, #tpu.memory_space<vmem>>, vector<2x128xf32>
      tpu.vector_store %arg9[%c0_27, %c0_28], %26 {strides = array<i32>} : memref<2x128xf32, #tpu.memory_space<vmem>>, vector<2x128xf32>,
    } else {
    }
    return
  }
  func.func @transform_0(%arg0: i32, %arg1: i32) -> (i32, i32, i32) {
    %c0_i32 = arith.constant 0 : i32
    %c0_i32_0 = arith.constant 0 : i32
    return %arg0, %arg1, %c0_i32 : i32, i32, i32
  }
  func.func @transform_1(%arg0: i32, %arg1: i32) -> (i32, i32) {
    %c0_i32 = arith.constant 0 : i32
    %c0_i32_0 = arith.constant 0 : i32
    return %arg0, %c0_i32 : i32, i32
  }
  func.func @transform_2(%arg0: i32, %arg1: i32) -> (i32, i32) {
    %c0_i32 = arith.constant 0 : i32
    %c0_i32_0 = arith.constant 0 : i32
    return %arg0, %c0_i32 : i32, i32
  }
  func.func @transform_3(%arg0: i32, %arg1: i32) -> (i32, i32) {
    %c0_i32 = arith.constant 0 : i32
    %c0_i32_0 = arith.constant 0 : i32
    %c0_i32_1 = arith.constant 0 : i32
    return %c0_i32, %c0_i32_0 : i32, i32
  }
  func.func @transform_4(%arg0: i32, %arg1: i32) -> (i32, i32) {
    %c0_i32 = arith.constant 0 : i32
    %c0_i32_0 = arith.constant 0 : i32
    %c0_i32_1 = arith.constant 0 : i32
    return %c0_i32, %c0_i32_0 : i32, i32
  }
  func.func @transform_5(%arg0: i32, %arg1: i32) -> (i32, i32) {
    %c0_i32 = arith.constant 0 : i32
    %c0_i32_0 = arith.constant 0 : i32
    %c0_i32_1 = arith.constant 0 : i32
    return %c0_i32, %c0_i32_0 : i32, i32
  }
  func.func @transform_6(%arg0: i32, %arg1: i32) -> (i32, i32) {
    %c0_i32 = arith.constant 0 : i32
    %c0_i32_0 = arith.constant 0 : i32
    %c0_i32_1 = arith.constant 0 : i32
    return %c0_i32, %c0_i32_0 : i32, i32
  }
  func.func @transform_7(%arg0: i32, %arg1: i32) -> (i32, i32) {
    %c0_i32 = arith.constant 0 : i32
    %c0_i32_0 = arith.constant 0 : i32
    return %arg0, %c0_i32 : i32, i32
  }
}

module attributes {stable_mosaic.version = 11 : i64} {
  func.func @_fused_avgpool_linear_kernel(%arg0: i32, %arg1: i32, %arg2: memref<2x8x32xf32, #tpu.memory_space<vmem>>, %arg3: memref<2x32xf32, #tpu.memory_space<vmem>>, %arg4: memref<2x32xf32, #tpu.memory_space<vmem>>, %arg5: memref<32x128xf32, #tpu.memory_space<vmem>>, %arg6: memref<32x128xf32, #tpu.memory_space<vmem>>, %arg7: memref<32x128xf32, #tpu.memory_space<vmem>>, %arg8: memref<1x128xf32, #tpu.memory_space<vmem>>, %arg9: memref<2x128xf32, #tpu.memory_space<vmem>>, %arg10: memref<2x32xf32, #tpu.memory_space<vmem>>) attributes {dimension_semantics = [#tpu.dimension_semantics<parallel>, #tpu.dimension_semantics<arbitrary>], iteration_bounds = array<i64: 1, 1>, scalar_prefetch = 0 : i64, scratch_operands = 1 : i64, tpu.core_type = #tpu.core_type<tc>, window_params = [{transform_indices = @transform_0, window_bounds = array<i64: 2, 8, 32>}, {transform_indices = @transform_1, window_bounds = array<i64: 2, 32>}, {transform_indices = @transform_2, window_bounds = array<i64: 2, 32>}, {pipeline_mode = #tpu.pipeline_mode<synchronous>, transform_indices = @transform_3, window_bounds = array<i64: 32, 128>}, {pipeline_mode = #tpu.pipeline_mode<synchronous>, transform_indices = @transform_4, window_bounds = array<i64: 32, 128>}, {pipeline_mode = #tpu.pipeline_mode<synchronous>, transform_indices = @transform_5, window_bounds = array<i64: 32, 128>}, {pipeline_mode = #tpu.pipeline_mode<synchronous>, transform_indices = @transform_6, window_bounds = array<i64: 1, 128>}, {transform_indices = @transform_7, window_bounds = array<i64: 2, 128>}]} {
    %c0_i32 = arith.constant 0 : i32
    %0 = arith.cmpi eq, %arg1, %c0_i32 : i32
    %1 = arith.extui %0 : i1 to i32
    %c0_i32_0 = arith.constant 0 : i32
    %2 = arith.cmpi ne, %1, %c0_i32_0 : i32
    scf.if %2 {
      %cst_9 = arith.constant 0.000000e+00 : f32
      %11 = vector.broadcast %cst_9 : f32 to vector<2x32xf32>
      %c0_10 = arith.constant 0 : index
      %c0_11 = arith.constant 0 : index
      %12 = vector.load %arg10[%c0_10, %c0_11] : memref<2x32xf32, #tpu.memory_space<vmem>>, vector<2x32xf32>
      tpu.vector_store %arg10[%c0_10, %c0_11], %11 {strides = array<i32>} : memref<2x32xf32, #tpu.memory_space<vmem>>, vector<2x32xf32>,
    } else {
    }
    %c0 = arith.constant 0 : index
    %c0_1 = arith.constant 0 : index
    %3 = vector.load %arg10[%c0, %c0_1] : memref<2x32xf32, #tpu.memory_space<vmem>>, vector<2x32xf32>
    %c0_2 = arith.constant 0 : index
    %c0_3 = arith.constant 0 : index
    %c0_4 = arith.constant 0 : index
    %4 = vector.load %arg2[%c0_2, %c0_3, %c0_4] : memref<2x8x32xf32, #tpu.memory_space<vmem>>, vector<2x8x32xf32>
    %cst = arith.constant dense<0.000000e+00> : vector<2x32xf32>
    %5 = vector.multi_reduction <add>, %4, %cst [1] : vector<2x8x32xf32> to vector<2x32xf32>
    %6 = arith.addf %3, %5 : vector<2x32xf32>
    %c0_5 = arith.constant 0 : index
    %c0_6 = arith.constant 0 : index
    %7 = vector.load %arg10[%c0_5, %c0_6] : memref<2x32xf32, #tpu.memory_space<vmem>>, vector<2x32xf32>
    tpu.vector_store %arg10[%c0_5, %c0_6], %6 {strides = array<i32>} : memref<2x32xf32, #tpu.memory_space<vmem>>, vector<2x32xf32>,
    %c0_i32_7 = arith.constant 0 : i32
    %8 = arith.cmpi eq, %arg1, %c0_i32_7 : i32
    %9 = arith.extui %8 : i1 to i32
    %c0_i32_8 = arith.constant 0 : i32
    %10 = arith.cmpi ne, %9, %c0_i32_8 : i32
    scf.if %10 {
      %c0_9 = arith.constant 0 : index
      %c0_10 = arith.constant 0 : index
      %11 = vector.load %arg10[%c0_9, %c0_10] : memref<2x32xf32, #tpu.memory_space<vmem>>, vector<2x32xf32>
      %cst_11 = arith.constant 1.250000e-01 : f32
      %12 = vector.broadcast %cst_11 : f32 to vector<2x32xf32>
      %13 = arith.mulf %11, %12 : vector<2x32xf32>
      %c0_12 = arith.constant 0 : index
      %c0_13 = arith.constant 0 : index
      %14 = vector.load %arg7[%c0_12, %c0_13] : memref<32x128xf32, #tpu.memory_space<vmem>>, vector<32x128xf32>
      %cst_14 = arith.constant dense<0.000000e+00> : vector<2x128xf32>
      %15 = tpu.matmul %13, %14, %cst_14 {dimension_numbers = #tpu.dot_dimension_numbers<[1], [0], [0], [1], [0, 0, 1, 1], [], []>} : vector<2x32xf32>, vector<32x128xf32>, vector<2x128xf32> -> vector<2x128xf32>
      %c0_15 = arith.constant 0 : index
      %c0_16 = arith.constant 0 : index
      %16 = vector.load %arg3[%c0_15, %c0_16] : memref<2x32xf32, #tpu.memory_space<vmem>>, vector<2x32xf32>
      %c0_17 = arith.constant 0 : index
      %c0_18 = arith.constant 0 : index
      %17 = vector.load %arg5[%c0_17, %c0_18] : memref<32x128xf32, #tpu.memory_space<vmem>>, vector<32x128xf32>
      %cst_19 = arith.constant dense<0.000000e+00> : vector<2x128xf32>
      %18 = tpu.matmul %16, %17, %cst_19 {dimension_numbers = #tpu.dot_dimension_numbers<[1], [0], [0], [1], [0, 0, 1, 1], [], []>} : vector<2x32xf32>, vector<32x128xf32>, vector<2x128xf32> -> vector<2x128xf32>
      %19 = arith.addf %15, %18 : vector<2x128xf32>
      %c0_20 = arith.constant 0 : index
      %c0_21 = arith.constant 0 : index
      %20 = vector.load %arg4[%c0_20, %c0_21] : memref<2x32xf32, #tpu.memory_space<vmem>>, vector<2x32xf32>
      %c0_22 = arith.constant 0 : index
      %c0_23 = arith.constant 0 : index
      %21 = vector.load %arg6[%c0_22, %c0_23] : memref<32x128xf32, #tpu.memory_space<vmem>>, vector<32x128xf32>
      %cst_24 = arith.constant dense<0.000000e+00> : vector<2x128xf32>
      %22 = tpu.matmul %20, %21, %cst_24 {dimension_numbers = #tpu.dot_dimension_numbers<[1], [0], [0], [1], [0, 0, 1, 1], [], []>} : vector<2x32xf32>, vector<32x128xf32>, vector<2x128xf32> -> vector<2x128xf32>
      %23 = arith.addf %19, %22 : vector<2x128xf32>
      %c0_25 = arith.constant 0 : index
      %c0_26 = arith.constant 0 : index
      %24 = vector.load %arg8[%c0_25, %c0_26] : memref<1x128xf32, #tpu.memory_space<vmem>>, vector<1x128xf32>
      %25 = vector.broadcast %24 : vector<1x128xf32> to vector<2x128xf32>
      %26 = arith.addf %23, %25 : vector<2x128xf32>
      %c0_27 = arith.constant 0 : index
      %c0_28 = arith.constant 0 : index
      %27 = vector.load %arg9[%c0_27, %c0_28] : memref<2x128xf32, #tpu.memory_space<vmem>>, vector<2x128xf32>
      tpu.vector_store %arg9[%c0_27, %c0_28], %26 {strides = array<i32>} : memref<2x128xf32, #tpu.memory_space<vmem>>, vector<2x128xf32>,
    } else {
    }
    return
  }
  func.func @transform_0(%arg0: i32, %arg1: i32) -> (i32, i32, i32) {
    %c0_i32 = arith.constant 0 : i32
    %c0_i32_0 = arith.constant 0 : i32
    return %arg0, %arg1, %c0_i32 : i32, i32, i32
  }
  func.func @transform_1(%arg0: i32, %arg1: i32) -> (i32, i32) {
    %c0_i32 = arith.constant 0 : i32
    %c0_i32_0 = arith.constant 0 : i32
    return %arg0, %c0_i32 : i32, i32
  }
  func.func @transform_2(%arg0: i32, %arg1: i32) -> (i32, i32) {
    %c0_i32 = arith.constant 0 : i32
    %c0_i32_0 = arith.constant 0 : i32
    return %arg0, %c0_i32 : i32, i32
  }
  func.func @transform_3(%arg0: i32, %arg1: i32) -> (i32, i32) {
    %c0_i32 = arith.constant 0 : i32
    %c0_i32_0 = arith.constant 0 : i32
    %c0_i32_1 = arith.constant 0 : i32
    return %c0_i32, %c0_i32_0 : i32, i32
  }
  func.func @transform_4(%arg0: i32, %arg1: i32) -> (i32, i32) {
    %c0_i32 = arith.constant 0 : i32
    %c0_i32_0 = arith.constant 0 : i32
    %c0_i32_1 = arith.constant 0 : i32
    return %c0_i32, %c0_i32_0 : i32, i32
  }
  func.func @transform_5(%arg0: i32, %arg1: i32) -> (i32, i32) {
    %c0_i32 = arith.constant 0 : i32
    %c0_i32_0 = arith.constant 0 : i32
    %c0_i32_1 = arith.constant 0 : i32
    return %c0_i32, %c0_i32_0 : i32, i32
  }
  func.func @transform_6(%arg0: i32, %arg1: i32) -> (i32, i32) {
    %c0_i32 = arith.constant 0 : i32
    %c0_i32_0 = arith.constant 0 : i32
    %c0_i32_1 = arith.constant 0 : i32
    return %c0_i32, %c0_i32_0 : i32, i32
  }
  func.func @transform_7(%arg0: i32, %arg1: i32) -> (i32, i32) {
    %c0_i32 = arith.constant 0 : i32
    %c0_i32_0 = arith.constant 0 : i32
    return %arg0, %c0_i32 : i32, i32
  }
}

</mosaic_0001>

<bundles_post_ra>
// kernel: tpu_custom_call.1
= control target key start
LH: loop header
LB: loop body
LE: loop exit
PB: predicated region body
PF: predicated region fallthrough
CT: control target
= control target key end

     0   :  { %12 = vsyncpa [#allocation4], 0  ;;  %s732_s0 = inlined_call_operand.hbm [shape: f32[2,8,32], index: 0, kind: input, shape index: {}]   ;;  %s733_s1 = inlined_call_operand.vmem [shape: f32[2,32], index: 1, kind: input, shape index: {}]   ;;  %s734_s2 = inlined_call_operand.vmem [shape: f32[2,32], index: 2, kind: input, shape index: {}]   ;;  %s735_s3 = inlined_call_operand.hbm [shape: f32[32,128], index: 3, kind: input, shape index: {}]   ;;  %s736_s4 = inlined_call_operand.hbm [shape: f32[32,128], index: 4, kind: input, shape index: {}]   ;;  %s737_s5 = inlined_call_operand.hbm [shape: f32[32,128], index: 5, kind: input, shape index: {}]   ;;  %s738_s6 = inlined_call_operand.vmem [shape: f32[1,128], index: 6, kind: input, shape index: {}]   ;;  %s739_s7 = inlined_call_operand.hbm [shape: f32[2,128], index: 7, kind: output, shape index: {}]  }
   0x1   :  { %13 = vsyncpa [#allocation7], 0 }
   0x2   :  { %14 = vsyncpa [#allocation10], 0 }
   0x3   :  { %15 = vsyncpa [#allocation5], 0  ;;  %s577_s24 = smov [#allocation6]   ;;  %s578_s26 = smov [#allocation3]  }
   0x4   :  { %s37_s25 = sshll.u32 %s577_s24, 4  ;;  %s21_s27 = sshll.u32 %s578_s26, 4  ;;  %s38_s25 = int_to_ptr.vmem [resolvable:$true] %s37_s25  ;;  %s627_s27 = int_to_ptr.vmem [resolvable:$true] %s21_s27 }
   0x5   :  { %s459_s30 = scalar_lea.hbm %s735_s3, 512 }
   0x6   :  { %p460_p0 = scmp.ne.s32.totalorder %s735_s3, %s459_s30  ;;  %p463_p1 = scmp.lt.u32.totalorder %s459_s30, %s735_s3 }
   0x8   :  { %p465_p2 = pnand %p463_p1, %p460_p0 }
   0xa   :  { %468 = shalt.err (!%p465_p2)
}
   0xb   :  { %s469_s12 = scalar_lea.vmem %s38_s25, 512  ;;  %p474_p4 = scmp.lt.s32.totalorder %s38_s25, %s38_s25 }
   0xc   :  { %p470_p3 = scmp.ne.s32.totalorder %s38_s25, %s469_s12  ;;  %p475_p5 = scmp.lt.s32.totalorder %s469_s12, %s469_s12 }
   0xe   :  { %p476_p6 = por %p475_p5, %p474_p4 }
  0x10   :  { %p477_p7 = pnand %p476_p6, %p470_p3 }
  0x12   :  { %480 = shalt.err (!%p477_p7)
}
  0x13   :  { %s579_s13 = smov 128   ;;  %s580_s14 = smov 8  }
  0x14   :  { %43 = dma.hbm_to_vmem [thread:$0]  %s735_s3, 512, %s38_s25, [#allocation7], %s579_s13, %s579_s13, %s580_s14  }
  0x15   :  { %s481_s19 = scalar_lea.hbm %s732_s0, 256 }
  0x16   :  { %p482_p8 = scmp.ne.s32.totalorder %s732_s0, %s481_s19  ;;  %p485_p9 = scmp.lt.u32.totalorder %s481_s19, %s732_s0 }
  0x18   :  { %p487_p10 = pnand %p485_p9, %p482_p8 }
  0x1a   :  { %490 = shalt.err (!%p487_p10)
}
  0x1b   :  { %s491_s24 = scalar_lea.vmem %s627_s27, 256  ;;  %p496_p12 = scmp.lt.s32.totalorder %s627_s27, %s627_s27 }
  0x1c   :  { %p492_p11 = scmp.ne.s32.totalorder %s627_s27, %s491_s24  ;;  %p497_p13 = scmp.lt.s32.totalorder %s491_s24, %s491_s24 }
  0x1e   :  { %p498_p0 = por %p497_p13, %p496_p12 }
  0x20   :  { %p499_p1 = pnand %p498_p0, %p492_p11 }
  0x22   :  { %502 = shalt.err (!%p499_p1)
}
  0x23   :  { %27 = dma.hbm_to_vmem [thread:$0]  %s732_s0, 256, %s627_s27, [#allocation4], %s579_s13, %s579_s13, %s580_s14  }
  0x24   :  { %s581_s26 = smov [#allocation8]   ;;  %s582_s29 = smov [#allocation9]  }
  0x25   :  { %s49_s28 = sshll.u32 %s581_s26, 4  ;;  %s61_s30 = sshll.u32 %s582_s29, 4  ;;  %s50_s28 = int_to_ptr.vmem [resolvable:$true] %s49_s28  ;;  %s664_s30 = int_to_ptr.vmem [resolvable:$true] %s61_s30 }
  0x26   :  { %s503_s10 = scalar_lea.hbm %s736_s4, 512 }
  0x27   :  { %p504_p2 = scmp.ne.s32.totalorder %s736_s4, %s503_s10  ;;  %p507_p3 = scmp.lt.u32.totalorder %s503_s10, %s736_s4 }
  0x29   :  { %p509_p4 = pnand %p507_p3, %p504_p2 }
  0x2b   :  { %512 = shalt.err (!%p509_p4)
}
  0x2c   :  { %s513_s0 = scalar_lea.vmem %s50_s28, 512  ;;  %p518_p6 = scmp.lt.s32.totalorder %s50_s28, %s50_s28 }
  0x2d   :  { %p514_p5 = scmp.ne.s32.totalorder %s50_s28, %s513_s0  ;;  %p519_p7 = scmp.lt.s32.totalorder %s513_s0, %s513_s0 }
  0x2f   :  { %p520_p8 = por %p519_p7, %p518_p6 }
  0x31   :  { %p521_p9 = pnand %p520_p8, %p514_p5 }
  0x33   :  { %524 = shalt.err (!%p521_p9)
}
  0x34   :  { %55 = dma.hbm_to_vmem [thread:$0]  %s736_s4, 512, %s50_s28, [#allocation7], %s579_s13, %s579_s13, %s580_s14  }
  0x35   :  { %s525_s20 = scalar_lea.hbm %s737_s5, 512 }
  0x36   :  { %p526_p10 = scmp.ne.s32.totalorder %s737_s5, %s525_s20  ;;  %p529_p11 = scmp.lt.u32.totalorder %s525_s20, %s737_s5 }
  0x38   :  { %p531_p12 = pnand %p529_p11, %p526_p10 }
  0x3a   :  { %534 = shalt.err (!%p531_p12)
}
  0x3b   :  { %s535_s3 = scalar_lea.vmem %s664_s30, 512  ;;  %p540_p0 = scmp.lt.s32.totalorder %s664_s30, %s664_s30 }
  0x3c   :  { %p536_p13 = scmp.ne.s32.totalorder %s664_s30, %s535_s3  ;;  %p541_p1 = scmp.lt.s32.totalorder %s535_s3, %s535_s3 }
  0x3e   :  { %p542_p2 = por %p541_p1, %p540_p0 }
  0x40   :  { %p543_p3 = pnand %p542_p2, %p536_p13 }
  0x42   :  { %546 = shalt.err (!%p543_p3)
}
  0x43   :  { %67 = dma.hbm_to_vmem [thread:$0]  %s737_s5, 512, %s664_s30, [#allocation10], %s579_s13, %s579_s13, %s580_s14  }
  0x44   :  { %569 = dma.done.wait [#allocation4], 256  }
  0x45   :  { %570 = vsyncadd [#allocation4], 4294967040 }
  0x46   :  { %571 = dma.done.wait [#allocation7], 1024  }
  0x47   :  { %572 = vsyncadd [#allocation7], 4294966272 }
  0x48   :  { %573 = dma.done.wait [#allocation10], 512  }
  0x49   :  { %574 = vsyncadd [#allocation10], 4294966784  ;;  %vm86_vm0 = vcmask 254976   ;;  %v583_v0 = vmov 0.0|0.0   ;;  %v584_v1 = vmov 0.0   ;;  %vm585_vm1 = vmmov 0  }
  0x4a   :  { %431 = vmatprep.subr.bf16.mxu0 %v583_v0  ;;  %437 = vmatprep.subr.bf16.mxu1 %v583_v0  ;;  %87 = vst.msk [vmem:[#allocation2] sm:$0x3] %vm86_vm0, %v584_v1  ;;  %v124_v2 = vld [vmem:[#allocation6] sm:$0xff]  ;;  %v125_v3 = vld [vmem:[#allocation6 + $0x8] sm:$0xff]  ;;  %v126_v4 = vld [vmem:[#allocation6 + $0x10] sm:$0xff]  ;;  %vm91_vm2 = vcmask 261120  }
  0x4b   :  { %406 = vmatprep.mubr.msk.f32.mxu0 %vm585_vm1, %v584_v1  ;;  %417 = vmatprep.mubr.msk.f32.mxu1 %vm585_vm1, %v584_v1  ;;  %v432_v5 = vpack.c.bf16 %v125_v3, %v124_v2  ;;  %v127_v6 = vld [vmem:[#allocation6 + $0x18] sm:$0xff]  ;;  %v119_v7 = vld [vmem:[#allocation9] sm:$0xff]  ;;  %v120_v8 = vld [vmem:[#allocation9 + $0x8] sm:$0xff]  ;;  %vm108_vm3 = vcmask 1041409  }
  0x4c   :  { %v438_v9 = vpack.c.bf16 %v120_v8, %v119_v7  ;;  %v89_v10 = vld [vmem:[#allocation3] sm:$0xff]  ;;  %v90_v11 = vld [vmem:[#allocation3 + $0x8] sm:$0xff]  ;;  %v435_v12 = vpack.c.bf16 %v127_v6, %v126_v4  ;;  %v275_v15 = vld [vmem:[#allocation8] sm:$0xff] }
  0x4d   :  { %433 = vmatpush3.bf16.msra.mxu0 %v432_v5  ;;  %v92_v13 = vsel %vm91_vm2, %v89_v10, 0.0  ;;  %v99_v14 = vsel %vm91_vm2, %v90_v11, 0.0  ;;  %v276_v18 = vld [vmem:[#allocation8 + $0x8] sm:$0xff]  ;;  %v121_v19 = vld [vmem:[#allocation9 + $0x10] sm:$0xff]  ;;  %v122_v20 = vld [vmem:[#allocation9 + $0x18] sm:$0xff] }
  0x4e   :  { %434 = vmatprep.subr.bf16.mxu0 %v583_v0  ;;  %439 = vmatpush3.bf16.msra.mxu1 %v438_v9  ;;  %v93_v16 = vrot.slane %v92_v13, 4  ;;  %v100_v17 = vrot.slane %v99_v14, 4  ;;  %v441_v21 = vpack.c.bf16 %v122_v20, %v121_v19  ;;  %v123_v24 = vld [vmem:[%s733_s1] sm:$0x3]  ;;  %v444_v25 = vpack.c.bf16 %v276_v18, %v275_v15  ;;  %v277_v28 = vld [vmem:[#allocation8 + $0x10] sm:$0xff]  ;;  %v278_v29 = vld [vmem:[#allocation8 + $0x18] sm:$0xff] }
  0x4f   :  { %440 = vmatprep.subr.bf16.mxu1 %v583_v0  ;;  %v447_v32 = vpack.c.bf16 %v278_v29, %v277_v28  ;;  %v274_v38 = vld [vmem:[%s734_s2] sm:$0x3]  ;;  %s586_s2 = smov [#allocation11]  }
  0x50   :  { %v94_v22 = vadd.f32 %v93_v16, %v92_v13  ;;  %v101_v23 = vadd.f32 %v100_v17, %v99_v14  ;;  %v382_v50 = vld [vmem:[%s738_s6] ss:$0 sm:$0xff]  ;;  %s368_s29 = sshll.u32 %s586_s2, 4  ;;  %s369_s29 = int_to_ptr.vmem [resolvable:$true] %s368_s29 }
  0x51   :  { %436 = vmatpush3.bf16.msra.mxu0 %v435_v12  ;;  %v88_v35 = vld [vmem:[#allocation2] sm:$0x3]  ;;  %s547_s30 = scalar_lea.vmem %s369_s29, 32  ;;  %p552_p5 = scmp.lt.s32.totalorder %s369_s29, %s369_s29 }
  0x52   :  { %443 = vmatprep.subr.bf16.mxu0 %v583_v0  ;;  %v95_v26 = vrot.slane %v94_v22, 2  ;;  %v102_v27 = vrot.slane %v101_v23, 2  ;;  %442 = vmatpush3.bf16.msra.mxu1 %v441_v21  ;;  %p548_p4 = scmp.ne.s32.totalorder %s369_s29, %s547_s30  ;;  %p553_p6 = scmp.lt.s32.totalorder %s547_s30, %s547_s30 }
  0x54   :  { %v96_v30 = vadd.f32 %v95_v26, %v94_v22  ;;  %v103_v31 = vadd.f32 %v102_v27, %v101_v23  ;;  %407 = vmatmul.mubr.msk.f32.vlgmr.msra.gmra.mrb[0].mxu0 %vm91_vm2, %v123_v24  ;;  %p554_p7 = por %p553_p6, %p552_p5 }
  0x55   :  { %445 = vmatpush3.bf16.msra.mxu0 %v444_v25  ;;  %428 = vmatprep.mubr.msk.f32.mxu0 %vm585_vm1, %v584_v1 }
  0x56   :  { %v97_v33 = vrot.slane %v96_v30, 1  ;;  %v104_v34 = vrot.slane %v103_v31, 1  ;;  %446 = vmatprep.subr.bf16.mxu0 %v583_v0  ;;  %p555_p8 = pnand %p554_p7, %p548_p4 }
  0x58   :  { %v98_v36 = vadd.f32 %v97_v33, %v96_v30  ;;  %v105_v37 = vadd.f32 %v104_v34, %v103_v31 }
  0x59   :  { %448 = vmatpush3.bf16.msra.mxu0 %v447_v32 }
  0x5a   :  { %v109_v39 = vsel %vm108_vm3, %v105_v37, %v98_v36 }
  0x5b   :  { %v111_v40 = vadd.f32 %v109_v39, %v88_v35 }
  0x5c   :  { %429 = vmatmul.mubr.msk.f32.vlgmr.msra.gmra.mrb[2].mxu0 %vm91_vm2, %v274_v38 }
  0x5d   :  { %113 = vst.msk [vmem:[#allocation2] sm:$0x3] %vm86_vm0, %v111_v40 }
  0x64   :  { %v117_v41 = vld [vmem:[#allocation2] sm:$0x3] }
  0x65   :  { %v118_v42 = vmul.f32 0.125, %v117_v41 }
  0x67   :  { %418 = vmatmul.mubr.msk.f32.vlgmr.msra.gmra.mrb[0].mxu1 %vm91_vm2, %v118_v42 }
 0x127   :  { %v197_v43 = vpop.f32.mrb[0].mxu0 }
 0x128   :  { %v408_v44 = vpop.f32.mrb[1].mxu0 }
 0x12f   :  { %v348_v45 = vpop.f32.mrb[2].mxu0 }
 0x130   :  { %v430_v46 = vpop.f32.mrb[3].mxu0 }
 0x13a   :  { %v270_v47 = vpop.f32.mrb[0].mxu1 }
 0x13b   :  { %v271_v48 = vadd.f32 %v270_v47, %v197_v43  ;;  %v419_v49 = vpop.f32.mrb[1].mxu1 }
 0x13d   :  { %v352_v51 = vadd.f32 %v348_v45, %v271_v48 }
 0x13f   :  { %v360_v52 = vadd.f32 %v382_v50, %v352_v51 }
 0x141   :  { %361 = vst [vmem:[#allocation11] sm:$0x3] %v360_v52 }
 0x142   :  { %558 = shalt.err (!%p555_p8)
}
 0x143   :  { %s559_s10 = scalar_lea.hbm %s739_s7, 32 }
 0x144   :  { %p560_p9 = scmp.ne.s32.totalorder %s739_s7, %s559_s10  ;;  %p563_p10 = scmp.lt.u32.totalorder %s559_s10, %s739_s7 }
 0x146   :  { %p565_p11 = pnand %p563_p10, %p560_p9 }
 0x148   :  { %568 = shalt.err (!%p565_p11)
}
 0x149   :  { %371 = dma.vmem_to_hbm [thread:$0]  %s369_s29, 32, %s739_s7, [#allocation5]  }
 0x14a   :  { %575 = dma.done.wait [#allocation5], 32  }
 0x14b   :  { %576 = vsyncadd [#allocation5], 4294967264 }
 0x14c   :  { %375 = vsyncpa [#allocation4], 1 }
 0x14d   :  { %376 = vsyncpa [#allocation7], 1 }
 0x14e   :  { %377 = vsyncpa [#allocation10], 1 }
 0x14f   :  { %378 = vsyncpa [#allocation5], 1 }

// kernel: tpu_custom_call.1
= control target key start
LH: loop header
LB: loop body
LE: loop exit
PB: predicated region body
PF: predicated region fallthrough
CT: control target
= control target key end

     0   :  { %12 = vsyncpa [#allocation4], 0  ;;  %s732_s0 = inlined_call_operand.hbm [shape: f32[2,8,32], index: 0, kind: input, shape index: {}]   ;;  %s733_s1 = inlined_call_operand.vmem [shape: f32[2,32], index: 1, kind: input, shape index: {}]   ;;  %s734_s2 = inlined_call_operand.vmem [shape: f32[2,32], index: 2, kind: input, shape index: {}]   ;;  %s735_s3 = inlined_call_operand.hbm [shape: f32[32,128], index: 3, kind: input, shape index: {}]   ;;  %s736_s4 = inlined_call_operand.hbm [shape: f32[32,128], index: 4, kind: input, shape index: {}]   ;;  %s737_s5 = inlined_call_operand.hbm [shape: f32[32,128], index: 5, kind: input, shape index: {}]   ;;  %s738_s6 = inlined_call_operand.vmem [shape: f32[1,128], index: 6, kind: input, shape index: {}]   ;;  %s739_s7 = inlined_call_operand.hbm [shape: f32[2,128], index: 7, kind: output, shape index: {}]  }
   0x1   :  { %13 = vsyncpa [#allocation7], 0 }
   0x2   :  { %14 = vsyncpa [#allocation10], 0 }
   0x3   :  { %15 = vsyncpa [#allocation5], 0  ;;  %s577_s24 = smov [#allocation6]   ;;  %s578_s26 = smov [#allocation3]  }
   0x4   :  { %s37_s25 = sshll.u32 %s577_s24, 4  ;;  %s21_s27 = sshll.u32 %s578_s26, 4  ;;  %s38_s25 = int_to_ptr.vmem [resolvable:$true] %s37_s25  ;;  %s627_s27 = int_to_ptr.vmem [resolvable:$true] %s21_s27 }
   0x5   :  { %s459_s30 = scalar_lea.hbm %s735_s3, 512 }
   0x6   :  { %p460_p0 = scmp.ne.s32.totalorder %s735_s3, %s459_s30  ;;  %p463_p1 = scmp.lt.u32.totalorder %s459_s30, %s735_s3 }
   0x8   :  { %p465_p2 = pnand %p463_p1, %p460_p0 }
   0xa   :  { %468 = shalt.err (!%p465_p2)
}
   0xb   :  { %s469_s12 = scalar_lea.vmem %s38_s25, 512  ;;  %p474_p4 = scmp.lt.s32.totalorder %s38_s25, %s38_s25 }
   0xc   :  { %p470_p3 = scmp.ne.s32.totalorder %s38_s25, %s469_s12  ;;  %p475_p5 = scmp.lt.s32.totalorder %s469_s12, %s469_s12 }
   0xe   :  { %p476_p6 = por %p475_p5, %p474_p4 }
  0x10   :  { %p477_p7 = pnand %p476_p6, %p470_p3 }
  0x12   :  { %480 = shalt.err (!%p477_p7)
}
  0x13   :  { %s579_s13 = smov 128   ;;  %s580_s14 = smov 8  }
  0x14   :  { %43 = dma.hbm_to_vmem [thread:$0]  %s735_s3, 512, %s38_s25, [#allocation7], %s579_s13, %s579_s13, %s580_s14  }
  0x15   :  { %s481_s19 = scalar_lea.hbm %s732_s0, 256 }
  0x16   :  { %p482_p8 = scmp.ne.s32.totalorder %s732_s0, %s481_s19  ;;  %p485_p9 = scmp.lt.u32.totalorder %s481_s19, %s732_s0 }
  0x18   :  { %p487_p10 = pnand %p485_p9, %p482_p8 }
  0x1a   :  { %490 = shalt.err (!%p487_p10)
}
  0x1b   :  { %s491_s24 = scalar_lea.vmem %s627_s27, 256  ;;  %p496_p12 = scmp.lt.s32.totalorder %s627_s27, %s627_s27 }
  0x1c   :  { %p492_p11 = scmp.ne.s32.totalorder %s627_s27, %s491_s24  ;;  %p497_p13 = scmp.lt.s32.totalorder %s491_s24, %s491_s24 }
  0x1e   :  { %p498_p0 = por %p497_p13, %p496_p12 }
  0x20   :  { %p499_p1 = pnand %p498_p0, %p492_p11 }
  0x22   :  { %502 = shalt.err (!%p499_p1)
}
  0x23   :  { %27 = dma.hbm_to_vmem [thread:$0]  %s732_s0, 256, %s627_s27, [#allocation4], %s579_s13, %s579_s13, %s580_s14  }
  0x24   :  { %s581_s26 = smov [#allocation8]   ;;  %s582_s29 = smov [#allocation9]  }
  0x25   :  { %s49_s28 = sshll.u32 %s581_s26, 4  ;;  %s61_s30 = sshll.u32 %s582_s29, 4  ;;  %s50_s28 = int_to_ptr.vmem [resolvable:$true] %s49_s28  ;;  %s664_s30 = int_to_ptr.vmem [resolvable:$true] %s61_s30 }
  0x26   :  { %s503_s10 = scalar_lea.hbm %s736_s4, 512 }
  0x27   :  { %p504_p2 = scmp.ne.s32.totalorder %s736_s4, %s503_s10  ;;  %p507_p3 = scmp.lt.u32.totalorder %s503_s10, %s736_s4 }
  0x29   :  { %p509_p4 = pnand %p507_p3, %p504_p2 }
  0x2b   :  { %512 = shalt.err (!%p509_p4)
}
  0x2c   :  { %s513_s0 = scalar_lea.vmem %s50_s28, 512  ;;  %p518_p6 = scmp.lt.s32.totalorder %s50_s28, %s50_s28 }
  0x2d   :  { %p514_p5 = scmp.ne.s32.totalorder %s50_s28, %s513_s0  ;;  %p519_p7 = scmp.lt.s32.totalorder %s513_s0, %s513_s0 }
  0x2f   :  { %p520_p8 = por %p519_p7, %p518_p6 }
  0x31   :  { %p521_p9 = pnand %p520_p8, %p514_p5 }
  0x33   :  { %524 = shalt.err (!%p521_p9)
}
  0x34   :  { %55 = dma.hbm_to_vmem [thread:$0]  %s736_s4, 512, %s50_s28, [#allocation7], %s579_s13, %s579_s13, %s580_s14  }
  0x35   :  { %s525_s20 = scalar_lea.hbm %s737_s5, 512 }
  0x36   :  { %p526_p10 = scmp.ne.s32.totalorder %s737_s5, %s525_s20  ;;  %p529_p11 = scmp.lt.u32.totalorder %s525_s20, %s737_s5 }
  0x38   :  { %p531_p12 = pnand %p529_p11, %p526_p10 }
  0x3a   :  { %534 = shalt.err (!%p531_p12)
}
  0x3b   :  { %s535_s3 = scalar_lea.vmem %s664_s30, 512  ;;  %p540_p0 = scmp.lt.s32.totalorder %s664_s30, %s664_s30 }
  0x3c   :  { %p536_p13 = scmp.ne.s32.totalorder %s664_s30, %s535_s3  ;;  %p541_p1 = scmp.lt.s32.totalorder %s535_s3, %s535_s3 }
  0x3e   :  { %p542_p2 = por %p541_p1, %p540_p0 }
  0x40   :  { %p543_p3 = pnand %p542_p2, %p536_p13 }
  0x42   :  { %546 = shalt.err (!%p543_p3)
}
  0x43   :  { %67 = dma.hbm_to_vmem [thread:$0]  %s737_s5, 512, %s664_s30, [#allocation10], %s579_s13, %s579_s13, %s580_s14  }
  0x44   :  { %569 = dma.done.wait [#allocation4], 256  }
  0x45   :  { %570 = vsyncadd [#allocation4], 4294967040 }
  0x46   :  { %571 = dma.done.wait [#allocation7], 1024  }
  0x47   :  { %572 = vsyncadd [#allocation7], 4294966272 }
  0x48   :  { %573 = dma.done.wait [#allocation10], 512  }
  0x49   :  { %574 = vsyncadd [#allocation10], 4294966784  ;;  %vm86_vm0 = vcmask 254976   ;;  %v583_v0 = vmov 0.0|0.0   ;;  %v584_v1 = vmov 0.0   ;;  %vm585_vm1 = vmmov 0  }
  0x4a   :  { %431 = vmatprep.subr.bf16.mxu0 %v583_v0  ;;  %437 = vmatprep.subr.bf16.mxu1 %v583_v0  ;;  %87 = vst.msk [vmem:[#allocation2] sm:$0x3] %vm86_vm0, %v584_v1  ;;  %v124_v2 = vld [vmem:[#allocation6] sm:$0xff]  ;;  %v125_v3 = vld [vmem:[#allocation6 + $0x8] sm:$0xff]  ;;  %v126_v4 = vld [vmem:[#allocation6 + $0x10] sm:$0xff]  ;;  %vm91_vm2 = vcmask 261120  }
  0x4b   :  { %406 = vmatprep.mubr.msk.f32.mxu0 %vm585_vm1, %v584_v1  ;;  %417 = vmatprep.mubr.msk.f32.mxu1 %vm585_vm1, %v584_v1  ;;  %v432_v5 = vpack.c.bf16 %v125_v3, %v124_v2  ;;  %v127_v6 = vld [vmem:[#allocation6 + $0x18] sm:$0xff]  ;;  %v119_v7 = vld [vmem:[#allocation9] sm:$0xff]  ;;  %v120_v8 = vld [vmem:[#allocation9 + $0x8] sm:$0xff]  ;;  %vm108_vm3 = vcmask 1041409  }
  0x4c   :  { %v438_v9 = vpack.c.bf16 %v120_v8, %v119_v7  ;;  %v89_v10 = vld [vmem:[#allocation3] sm:$0xff]  ;;  %v90_v11 = vld [vmem:[#allocation3 + $0x8] sm:$0xff]  ;;  %v435_v12 = vpack.c.bf16 %v127_v6, %v126_v4  ;;  %v275_v15 = vld [vmem:[#allocation8] sm:$0xff] }
  0x4d   :  { %433 = vmatpush3.bf16.msra.mxu0 %v432_v5  ;;  %v92_v13 = vsel %vm91_vm2, %v89_v10, 0.0  ;;  %v99_v14 = vsel %vm91_vm2, %v90_v11, 0.0  ;;  %v276_v18 = vld [vmem:[#allocation8 + $0x8] sm:$0xff]  ;;  %v121_v19 = vld [vmem:[#allocation9 + $0x10] sm:$0xff]  ;;  %v122_v20 = vld [vmem:[#allocation9 + $0x18] sm:$0xff] }
  0x4e   :  { %434 = vmatprep.subr.bf16.mxu0 %v583_v0  ;;  %439 = vmatpush3.bf16.msra.mxu1 %v438_v9  ;;  %v93_v16 = vrot.slane %v92_v13, 4  ;;  %v100_v17 = vrot.slane %v99_v14, 4  ;;  %v441_v21 = vpack.c.bf16 %v122_v20, %v121_v19  ;;  %v123_v24 = vld [vmem:[%s733_s1] sm:$0x3]  ;;  %v444_v25 = vpack.c.bf16 %v276_v18, %v275_v15  ;;  %v277_v28 = vld [vmem:[#allocation8 + $0x10] sm:$0xff]  ;;  %v278_v29 = vld [vmem:[#allocation8 + $0x18] sm:$0xff] }
  0x4f   :  { %440 = vmatprep.subr.bf16.mxu1 %v583_v0  ;;  %v447_v32 = vpack.c.bf16 %v278_v29, %v277_v28  ;;  %v274_v38 = vld [vmem:[%s734_s2] sm:$0x3]  ;;  %s586_s2 = smov [#allocation11]  }
  0x50   :  { %v94_v22 = vadd.f32 %v93_v16, %v92_v13  ;;  %v101_v23 = vadd.f32 %v100_v17, %v99_v14  ;;  %v382_v50 = vld [vmem:[%s738_s6] ss:$0 sm:$0xff]  ;;  %s368_s29 = sshll.u32 %s586_s2, 4  ;;  %s369_s29 = int_to_ptr.vmem [resolvable:$true] %s368_s29 }
  0x51   :  { %436 = vmatpush3.bf16.msra.mxu0 %v435_v12  ;;  %v88_v35 = vld [vmem:[#allocation2] sm:$0x3]  ;;  %s547_s30 = scalar_lea.vmem %s369_s29, 32  ;;  %p552_p5 = scmp.lt.s32.totalorder %s369_s29, %s369_s29 }
  0x52   :  { %443 = vmatprep.subr.bf16.mxu0 %v583_v0  ;;  %v95_v26 = vrot.slane %v94_v22, 2  ;;  %v102_v27 = vrot.slane %v101_v23, 2  ;;  %442 = vmatpush3.bf16.msra.mxu1 %v441_v21  ;;  %p548_p4 = scmp.ne.s32.totalorder %s369_s29, %s547_s30  ;;  %p553_p6 = scmp.lt.s32.totalorder %s547_s30, %s547_s30 }
  0x54   :  { %v96_v30 = vadd.f32 %v95_v26, %v94_v22  ;;  %v103_v31 = vadd.f32 %v102_v27, %v101_v23  ;;  %407 = vmatmul.mubr.msk.f32.vlgmr.msra.gmra.mrb[0].mxu0 %vm91_vm2, %v123_v24  ;;  %p554_p7 = por %p553_p6, %p552_p5 }
  0x55   :  { %445 = vmatpush3.bf16.msra.mxu0 %v444_v25  ;;  %428 = vmatprep.mubr.msk.f32.mxu0 %vm585_vm1, %v584_v1 }
  0x56   :  { %v97_v33 = vrot.slane %v96_v30, 1  ;;  %v104_v34 = vrot.slane %v103_v31, 1  ;;  %446 = vmatprep.subr.bf16.mxu0 %v583_v0  ;;  %p555_p8 = pnand %p554_p7, %p548_p4 }
  0x58   :  { %v98_v36 = vadd.f32 %v97_v33, %v96_v30  ;;  %v105_v37 = vadd.f32 %v104_v34, %v103_v31 }
  0x59   :  { %448 = vmatpush3.bf16.msra.mxu0 %v447_v32 }
  0x5a   :  { %v109_v39 = vsel %vm108_vm3, %v105_v37, %v98_v36 }
  0x5b   :  { %v111_v40 = vadd.f32 %v109_v39, %v88_v35 }
  0x5c   :  { %429 = vmatmul.mubr.msk.f32.vlgmr.msra.gmra.mrb[2].mxu0 %vm91_vm2, %v274_v38 }
  0x5d   :  { %113 = vst.msk [vmem:[#allocation2] sm:$0x3] %vm86_vm0, %v111_v40 }
  0x64   :  { %v117_v41 = vld [vmem:[#allocation2] sm:$0x3] }
  0x65   :  { %v118_v42 = vmul.f32 0.125, %v117_v41 }
  0x67   :  { %418 = vmatmul.mubr.msk.f32.vlgmr.msra.gmra.mrb[0].mxu1 %vm91_vm2, %v118_v42 }
 0x127   :  { %v197_v43 = vpop.f32.mrb[0].mxu0 }
 0x128   :  { %v408_v44 = vpop.f32.mrb[1].mxu0 }
 0x12f   :  { %v348_v45 = vpop.f32.mrb[2].mxu0 }
 0x130   :  { %v430_v46 = vpop.f32.mrb[3].mxu0 }
 0x13a   :  { %v270_v47 = vpop.f32.mrb[0].mxu1 }
 0x13b   :  { %v271_v48 = vadd.f32 %v270_v47, %v197_v43  ;;  %v419_v49 = vpop.f32.mrb[1].mxu1 }
 0x13d   :  { %v352_v51 = vadd.f32 %v348_v45, %v271_v48 }
 0x13f   :  { %v360_v52 = vadd.f32 %v382_v50, %v352_v51 }
 0x141   :  { %361 = vst [vmem:[#allocation11] sm:$0x3] %v360_v52 }
 0x142   :  { %558 = shalt.err (!%p555_p8)
}
 0x143   :  { %s559_s10 = scalar_lea.hbm %s739_s7, 32 }
 0x144   :  { %p560_p9 = scmp.ne.s32.totalorder %s739_s7, %s559_s10  ;;  %p563_p10 = scmp.lt.u32.totalorder %s559_s10, %s739_s7 }
 0x146   :  { %p565_p11 = pnand %p563_p10, %p560_p9 }
 0x148   :  { %568 = shalt.err (!%p565_p11)
}
 0x149   :  { %371 = dma.vmem_to_hbm [thread:$0]  %s369_s29, 32, %s739_s7, [#allocation5]  }
 0x14a   :  { %575 = dma.done.wait [#allocation5], 32  }
 0x14b   :  { %576 = vsyncadd [#allocation5], 4294967264 }
 0x14c   :  { %375 = vsyncpa [#allocation4], 1 }
 0x14d   :  { %376 = vsyncpa [#allocation7], 1 }
 0x14e   :  { %377 = vsyncpa [#allocation10], 1 }
 0x14f   :  { %378 = vsyncpa [#allocation5], 1 }

</bundles_post_ra>
